<compile_context>
chip_gen: v7x
topology: tpu7x:2x2x1
jax: 0.10.0
libtpu: 0.0.40
codegen_flags: <defaults>
</compile_context>

<pallas_src>
import functools

import jax
import jax.numpy as jnp
from jax.experimental import pallas as pl
from jax.experimental.pallas import tpu as pltpu

_LANE = 128
_SUBLANE = 8
_TARGET_OUT_BLOCK_BYTES = 8 * 1024 * 1024   # ~8 MiB output tiles (store-bound)
_VMEM_SOFT_CAP = 40 * 1024 * 1024           # keep total well under v7x's 64 MiB


def _round_up(n: int, m: int) -> int:
    return ((n + m - 1) // m) * m


def _make_fuzz_kernel(membership_function: str, has_b: bool):
    """Pallas kernel body for one (TB, IO_pad) lane-dense output tile."""

    def kernel(*refs):
        if has_b:
            x_ref, e_ref, c_ref, s_ref, b_ref, o_ref = refs
        else:
            x_ref, e_ref, c_ref, s_ref, o_ref = refs

        # x_ref: (TB, I)        batch tile of inputs
        # e_ref: (I, IO_pad)    bf16 0/1 selector, E[i, i*O + o] = 1
        # c_ref: (1, IO_pad)    flattened centers (pad = 0)
        # s_ref: (1, IO_pad)    flattened pre-scaled parameter (pad = 1)
        #                       gaussian: 1/(2*sigma^2) | bell: 1/a | linear: a
        # b_ref: (1, IO_pad)    bell shape parameter (pad = 1), only if has_b
        # o_ref: (TB, IO_pad)
        x = x_ref[...].astype(jnp.float32)
        e = e_ref[...].astype(jnp.float32)   # 0/1 exact in bf16
        # Broadcast each feature across its O fuzzy terms (lane-dense) via the
        # MXU; exact because E is 0/1 and precision is HIGHEST.
        xb = jnp.dot(x, e, preferred_element_type=jnp.float32,
                     precision=jax.lax.Precision.HIGHEST)
        diff = xb - c_ref[...]               # (TB, IO_pad) - (1, IO_pad) broadcast
        s = s_ref[...]

        if membership_function == "gaussian":
            z = diff * s                     # s = 1 / (2 * sigma**2) (hoisted)
            out = jnp.exp(-(z * z))
        elif membership_function == "bell":
            t = diff * s                     # s = 1 / a (hoisted)
            if has_b:
                # |t|^(2b) = exp(2b * log|t|); t == 0 -> exp(-inf) = 0 (b > 0).
                b = b_ref[...]
                p = jnp.exp((2.0 * b) * jnp.log(jnp.abs(t)))
                out = pl.reciprocal(1.0 + p, approx=False)
            else:
                # Module initialises b = 2.0: |t|^(2b) == (t^2)^2, two VPU muls.
                t2 = t * t
                out = pl.reciprocal(1.0 + t2 * t2, approx=False)
        elif membership_function == "linear":
            out = s * diff + 0.5             # s = a
        else:
            raise ValueError(
                f"Membership function {membership_function} not supported.")

        o_ref[...] = out.astype(o_ref.dtype)

    return kernel


def _pick_batch_tile(batch: int, out_row_bytes: int) -> int:
    """Rows per tile: ~8 MiB output blocks, >= 2 grid steps when batch allows."""
    target_rows = max(
        _SUBLANE,
        ((_TARGET_OUT_BLOCK_BYTES // max(out_row_bytes, 1)) // _SUBLANE) * _SUBLANE)
    if batch < 2 * _SUBLANE:
        return batch  # block dim == full array dim is always legal
    tb = min(target_rows, _round_up(batch, _SUBLANE))
    # v7x has 2 TensorCores; "parallel" sharding needs >= 2 grid steps.
    half = _round_up(pl.cdiv(batch, 2), _SUBLANE)
    tb = min(tb, half)
    return max(_SUBLANE, (tb // _SUBLANE) * _SUBLANE)


@functools.partial(jax.jit, static_argnames=("membership_function", "out_dtype"))
def fuzzification(x, centers, sigma, b=None, *,
                  membership_function: str = "gaussian", out_dtype=None):
    """Pallas implementation of Fuzzification.forward.

    x:       (B, I)  float32
    centers: (I, O)  float32   (nn.Parameter `fuzzy_degree`)
    sigma:   (I, O)  float32   (sigma / bell width `a` / linear slope `a`)
    b:       optional (I, O)   bell shape parameter (defaults to 2.0 fast path)
    returns: (B, I, O) in out_dtype (defaults to x.dtype)
    """
    B, I = x.shape
    Ic, O = centers.shape
    assert I == Ic, "input_dim mismatch"
    IO = I * O
    IO_pad = _round_up(IO, _LANE)
    out_dtype = jnp.dtype(x.dtype if out_dtype is None else out_dtype)

    # Hoist grid-invariant parameter math out of the per-tile kernel body.
    if membership_function == "gaussian":
        scale = 1.0 / (2.0 * sigma * sigma)
    elif membership_function == "bell":
        scale = 1.0 / sigma
    elif membership_function == "linear":
        scale = sigma
    else:
        raise ValueError(
            f"Membership function {membership_function} not supported.")

    def flat_pad(a, fill):
        a = a.reshape(1, IO).astype(jnp.float32)   # row-major: [i*O + o]
        if IO_pad != IO:
            a = jnp.pad(a, ((0, 0), (0, IO_pad - IO)), constant_values=fill)
        return a

    c_flat = flat_pad(centers, 0.0)
    s_flat = flat_pad(scale, 1.0)

    expand = jnp.repeat(jnp.eye(I, dtype=jnp.float32), O, axis=1)   # (I, IO)
    if IO_pad != IO:
        expand = jnp.pad(expand, ((0, 0), (0, IO_pad - IO)))
    expand = expand.astype(jnp.bfloat16)    # 0/1 exact; halves HBM/VMEM for E

    has_b = (membership_function == "bell") and (b is not None)
    operands = [x, expand, c_flat, s_flat]
    if has_b:
        operands.append(flat_pad(jnp.asarray(b, jnp.float32), 1.0))

    out_isz = out_dtype.itemsize
    x_isz = jnp.dtype(x.dtype).itemsize
    tb = _pick_batch_tile(B, IO_pad * out_isz)

    n_par = 3 if has_b else 2
    def vmem_budget(tb_):
        # Conservatively count everything double-buffered.
        return 2 * (tb_ * IO_pad * out_isz + tb_ * I * x_isz
                    + I * IO_pad * 2 + n_par * IO_pad * 4)
    while tb > _SUBLANE and vmem_budget(tb) > _VMEM_SOFT_CAP:
        tb = max(_SUBLANE, ((tb // 2) // _SUBLANE) * _SUBLANE)

    vmem_limit = int(min(max(16 << 20, int(vmem_budget(tb) * 1.25) + (1 << 20)),
                         112 << 20))

    grid = (pl.cdiv(B, tb),)
    kernel = _make_fuzz_kernel(membership_function, has_b)

    in_specs = [
        pl.BlockSpec((tb, I), lambda bi: (bi, 0)),        # x batch tile
        pl.BlockSpec((I, IO_pad), lambda bi: (0, 0)),     # selector (grid-invariant)
        pl.BlockSpec((1, IO_pad), lambda bi: (0, 0)),     # centers
        pl.BlockSpec((1, IO_pad), lambda bi: (0, 0)),     # pre-scaled parameter
    ]
    if has_b:
        in_specs.append(pl.BlockSpec((1, IO_pad), lambda bi: (0, 0)))  # bell b

    out_flat = pl.pallas_call(
        kernel,
        out_shape=jax.ShapeDtypeStruct((B, IO_pad), out_dtype),
        grid_spec=pltpu.PrefetchScalarGridSpec(
            num_scalar_prefetch=0,
            grid=grid,
            in_specs=in_specs,
            out_specs=pl.BlockSpec((tb, IO_pad), lambda bi: (bi, 0)),
        ),
        compiler_params=pltpu.CompilerParams(
            dimension_semantics=("parallel",),   # shards batch tiles across v7x TCs
            vmem_limit_bytes=vmem_limit,
        ),
    )(*operands)

    if IO_pad != IO:
        out_flat = out_flat[:, :IO]             # drop lane padding (outside kernel)
    return out_flat.reshape(B, I, O)            # contiguous reshape (free)


# --- pure-JAX references mirroring the PyTorch membership functions ---
def _ref_gaussian(x, c, s):
    xe = x[:, :, None]
    z = (xe - c[None]) / (2.0 * s[None] ** 2)
    return jnp.exp(-(z ** 2))


def _ref_bell(x, c, a, b=2.0):
    xe = x[:, :, None]
    bexp = 2.0 * (b[None] if getattr(b, "ndim", 0) == 2 else b)
    return 1.0 / (1.0 + jnp.abs((xe - c[None]) / a[None]) ** bexp)


def _ref_linear(x, c, a):
    xe = x[:, :, None]
    return a[None] * (xe - c[None]) + 0.5


if __name__ == "__main__":
    key = jax.random.PRNGKey(0)
    kx, kc, ks, kb, kx2, kc2, ks2 = jax.random.split(key, 7)

    # Primary small config consistent with the module.
    batch, input_dim, output_dim = 2, 8, 16
    x = jax.random.normal(kx, (batch, input_dim), dtype=jnp.float32)
    fuzzy_degree = jax.random.normal(kc, (input_dim, output_dim), dtype=jnp.float32)
    sigma = 0.5 + jax.random.uniform(ks, (input_dim, output_dim), dtype=jnp.float32)

    out_g = jax.block_until_ready(
        fuzzification(x, fuzzy_degree, sigma, membership_function="gaussian"))
    assert out_g.shape == (batch, input_dim, output_dim)
    assert jnp.allclose(out_g, _ref_gaussian(x, fuzzy_degree, sigma),
                        atol=1e-5, rtol=1e-5), "gaussian mismatch vs reference"

    out_b = jax.block_until_ready(
        fuzzification(x, fuzzy_degree, sigma, membership_function="bell"))
    assert jnp.allclose(out_b, _ref_bell(x, fuzzy_degree, sigma),
                        atol=1e-5, rtol=1e-5), "bell (b=2) mismatch vs reference"

    # Bell with a non-default learnable shape parameter (general exp/log path).
    b_par = 1.0 + 2.0 * jax.random.uniform(kb, (input_dim, output_dim), dtype=jnp.float32)
    out_bb = jax.block_until_ready(
        fuzzification(x, fuzzy_degree, sigma, b_par, membership_function="bell"))
    assert jnp.allclose(out_bb, _ref_bell(x, fuzzy_degree, sigma, b_par),
                        atol=1e-5, rtol=1e-4), "bell (learnable b) mismatch vs reference"

    out_l = jax.block_until_ready(
        fuzzification(x, fuzzy_degree, sigma, membership_function="linear"))
    assert jnp.allclose(out_l, _ref_linear(x, fuzzy_degree, sigma),
                        atol=1e-5, rtol=1e-5), "linear mismatch vs reference"

    # Coverage: I*O not a multiple of 128 (lane padding) + >=2 grid steps with a
    # partial (masked) last batch tile.
    B2, I2, O2 = 40, 4, 10
    x2 = jax.random.normal(kx2, (B2, I2), dtype=jnp.float32)
    c2 = jax.random.normal(kc2, (I2, O2), dtype=jnp.float32)
    s2 = 0.5 + jax.random.uniform(ks2, (I2, O2), dtype=jnp.float32)
    out2 = jax.block_until_ready(
        fuzzification(x2, c2, s2, membership_function="gaussian"))
    assert out2.shape == (B2, I2, O2)
    assert jnp.allclose(out2, _ref_gaussian(x2, c2, s2),
                        atol=1e-5, rtol=1e-5), "padded/multi-tile gaussian mismatch"

    # Optional bf16 output (halves the dominant HBM store stream).
    out_bf16 = jax.block_until_ready(
        fuzzification(x, fuzzy_degree, sigma, membership_function="gaussian",
                      out_dtype=jnp.bfloat16))
    assert out_bf16.dtype == jnp.bfloat16
    assert jnp.allclose(out_bf16.astype(jnp.float32), _ref_gaussian(x, fuzzy_degree, sigma),
                        atol=1.5e-2, rtol=1.5e-2), "bf16 output mismatch vs reference"

    print("KERNEL_OK")
</pallas_src>

<mosaic_0001>
module attributes {stable_mosaic.version = 11 : i64} {
  func.func @kernel(%arg0: i32, %arg1: memref<2x8xf32, #tpu.memory_space<vmem>>, %arg2: memref<8x128xbf16, #tpu.memory_space<vmem>>, %arg3: memref<1x128xf32, #tpu.memory_space<vmem>>, %arg4: memref<1x128xf32, #tpu.memory_space<vmem>>, %arg5: memref<2x128xf32, #tpu.memory_space<vmem>>) attributes {dimension_semantics = [#tpu.dimension_semantics<parallel>], iteration_bounds = array<i64: 1>, scalar_prefetch = 0 : i64, scratch_operands = 0 : i64, tpu.core_type = #tpu.core_type<tc>, window_params = [{transform_indices = @transform_0, window_bounds = array<i64: 2, 8>}, {pipeline_mode = #tpu.pipeline_mode<synchronous>, transform_indices = @transform_1, window_bounds = array<i64: 8, 128>}, {pipeline_mode = #tpu.pipeline_mode<synchronous>, transform_indices = @transform_2, window_bounds = array<i64: 1, 128>}, {pipeline_mode = #tpu.pipeline_mode<synchronous>, transform_indices = @transform_3, window_bounds = array<i64: 1, 128>}, {transform_indices = @transform_4, window_bounds = array<i64: 2, 128>}]} {
    %c0 = arith.constant 0 : index
    %c0_0 = arith.constant 0 : index
    %0 = vector.load %arg1[%c0, %c0_0] : memref<2x8xf32, #tpu.memory_space<vmem>>, vector<2x8xf32>
    %c0_1 = arith.constant 0 : index
    %c0_2 = arith.constant 0 : index
    %1 = vector.load %arg2[%c0_1, %c0_2] : memref<8x128xbf16, #tpu.memory_space<vmem>>, vector<8x128xbf16>
    %2 = arith.extf %1 : vector<8x128xbf16> to vector<8x128xf32>
    %cst = arith.constant dense<0.000000e+00> : vector<2x128xf32>
    %3 = tpu.matmul %0, %2, %cst {dimension_numbers = #tpu.dot_dimension_numbers<[1], [0], [0], [1], [0, 0, 1, 1], [], []>, precision = #tpu.contract_precision<fp32>} : vector<2x8xf32>, vector<8x128xf32>, vector<2x128xf32> -> vector<2x128xf32>
    %c0_3 = arith.constant 0 : index
    %c0_4 = arith.constant 0 : index
    %4 = vector.load %arg3[%c0_3, %c0_4] : memref<1x128xf32, #tpu.memory_space<vmem>>, vector<1x128xf32>
    %5 = vector.broadcast %4 : vector<1x128xf32> to vector<2x128xf32>
    %6 = arith.subf %3, %5 : vector<2x128xf32>
    %c0_5 = arith.constant 0 : index
    %c0_6 = arith.constant 0 : index
    %7 = vector.load %arg4[%c0_5, %c0_6] : memref<1x128xf32, #tpu.memory_space<vmem>>, vector<1x128xf32>
    %8 = vector.broadcast %7 : vector<1x128xf32> to vector<2x128xf32>
    %9 = arith.mulf %6, %8 : vector<2x128xf32>
    %10 = arith.mulf %9, %9 : vector<2x128xf32>
    %cst_7 = arith.constant 0.000000e+00 : f32
    %11 = vector.broadcast %cst_7 : f32 to vector<2x128xf32>
    %12 = arith.subf %11, %10 : vector<2x128xf32>
    %13 = math.exp %12 : vector<2x128xf32>
    %c0_8 = arith.constant 0 : index
    %c0_9 = arith.constant 0 : index
    %14 = vector.load %arg5[%c0_8, %c0_9] : memref<2x128xf32, #tpu.memory_space<vmem>>, vector<2x128xf32>
    tpu.vector_store %arg5[%c0_8, %c0_9], %13 {strides = array<i32>} : memref<2x128xf32, #tpu.memory_space<vmem>>, vector<2x128xf32>,
    return
  }
  func.func @transform_0(%arg0: i32) -> (i32, i32) {
    %c0_i32 = arith.constant 0 : i32
    %c0_i32_0 = arith.constant 0 : i32
    return %arg0, %c0_i32 : i32, i32
  }
  func.func @transform_1(%arg0: i32) -> (i32, i32) {
    %c0_i32 = arith.constant 0 : i32
    %c0_i32_0 = arith.constant 0 : i32
    %c0_i32_1 = arith.constant 0 : i32
    return %c0_i32, %c0_i32_0 : i32, i32
  }
  func.func @transform_2(%arg0: i32) -> (i32, i32) {
    %c0_i32 = arith.constant 0 : i32
    %c0_i32_0 = arith.constant 0 : i32
    %c0_i32_1 = arith.constant 0 : i32
    return %c0_i32, %c0_i32_0 : i32, i32
  }
  func.func @transform_3(%arg0: i32) -> (i32, i32) {
    %c0_i32 = arith.constant 0 : i32
    %c0_i32_0 = arith.constant 0 : i32
    %c0_i32_1 = arith.constant 0 : i32
    return %c0_i32, %c0_i32_0 : i32, i32
  }
  func.func @transform_4(%arg0: i32) -> (i32, i32) {
    %c0_i32 = arith.constant 0 : i32
    %c0_i32_0 = arith.constant 0 : i32
    return %arg0, %c0_i32 : i32, i32
  }
}

</mosaic_0001>

<bundles_post_ra>
// kernel: fuzzification.1
= control target key start
LH: loop header
LB: loop body
LE: loop exit
PB: predicated region body
PF: predicated region fallthrough
CT: control target
= control target key end

     0   :  { %vm20_vm0 = vcmask 64512   ;;  %v546_v0 = vmov 0.0   ;;  %vm547_vm1 = vmmov 0   ;;  %s594_s1 = inlined_call_operand.vmem [shape: bf16[8,128], index: 1, kind: input, shape index: {}]   ;;  %s595_s0 = inlined_call_operand.vmem [shape: f32[2,8], index: 0, kind: input, shape index: {}]   ;;  %s596_s2 = inlined_call_operand.vmem [shape: f32[1,128], index: 2, kind: input, shape index: {}]   ;;  %s597_s3 = inlined_call_operand.vmem [shape: f32[1,128], index: 3, kind: input, shape index: {}]   ;;  %s598_s4 = inlined_call_operand.vmem [shape: f32[2,128], index: 4, kind: output, shape index: {}]  }
   0x1   :  { %518 = vmatprep.subr.mxu0 %v546_v0  ;;  %v18_v1 = vld [vmem:[%s594_s1] sm:$0xf]  ;;  %520 = vmatprep.mubr.msk.f32.mxu0 %vm547_vm1, %v546_v0 }
   0x2   :  { %v17_v2 = vld [vmem:[%s595_s0] sm:$0x3]  ;;  %v19_v3 = vunpack.c.l.bf16 %v18_v1  ;;  %503 = vmatprep.subr.mxu1 %v546_v0  ;;  %505 = vmatprep.mubr.msk.f32.mxu1 %vm547_vm1, %v546_v0 }
   0x3   :  { %v22_v4 = vsel %vm20_vm0, %v17_v2, 0  ;;  %v489_v17 = vld [vmem:[%s596_s2] ss:$0 sm:$0xff] }
   0x4   :  { %v89_v5 = vand.u32 4294901760, %v22_v4  ;;  %519 = vmatpush3.msra.mxu0 %v19_v3  ;;  %504 = vmatpush3.msra.mxu1 %v19_v3  ;;  %v100_v6 = vsub.f32 %v19_v3, %v19_v3  ;;  %v490_v20 = vld [vmem:[%s597_s3] ss:$0 sm:$0xff] }
   0x5   :  { %508 = vmatprep.subr.mxu1 %v546_v0  ;;  %523 = vmatprep.subr.mxu0 %v546_v0 }
   0x6   :  { %v90_v7 = vsub.f32 %v22_v4, %v89_v5  ;;  %v101_v8 = vand.u32 4294901760, %v100_v6 }
   0x8   :  { %v91_v9 = vand.u32 4294901760, %v90_v7  ;;  %v102_v10 = vsub.f32 %v100_v6, %v101_v8 }
   0xa   :  { %521 = vmatmul.mubr.f32.vlgmr.msra.gmra.mrb[0].mxu0 %v91_v9  ;;  %v92_v11 = vsub.f32 %v90_v7, %v91_v9  ;;  %v103_v12 = vand.u32 4294901760, %v102_v10 }
   0xb   :  { %524 = vmatpush3.msra.mxu0 %v101_v8  ;;  %525 = vmatprep.mubr.msk.f32.mxu0 %vm547_vm1, %v546_v0 }
   0xc   :  { %v93_v13 = vand.u32 4294901760, %v92_v11  ;;  %528 = vmatprep.subr.mxu0 %v546_v0 }
   0xe   :  { %506 = vmatmul.mubr.f32.vlgmr.msra.gmra.mrb[0].mxu1 %v93_v13 }
   0xf   :  { %509 = vmatpush3.msra.mxu1 %v103_v12  ;;  %510 = vmatprep.mubr.msk.f32.mxu1 %vm547_vm1, %v546_v0 }
  0x10   :  { %513 = vmatprep.subr.mxu1 %v546_v0 }
  0x12   :  { %526 = vmatmul.mubr.f32.vlgmr.msra.gmra.mrb[0].mxu0 %v89_v5 }
  0x13   :  { %529 = vmatpush3.msra.mxu0 %v19_v3  ;;  %530 = vmatprep.mubr.msk.f32.mxu0 %vm547_vm1, %v546_v0 }
  0x16   :  { %511 = vmatmul.mubr.f32.vlgmr.msra.gmra.mrb[0].mxu1 %v89_v5 }
  0x17   :  { %514 = vmatpush3.msra.mxu1 %v100_v6  ;;  %515 = vmatprep.mubr.msk.f32.mxu1 %vm547_vm1, %v546_v0 }
  0x1a   :  { %531 = vmatmul.mubr.f32.vlgmr.msra.gmra.mrb[0].mxu0 %v89_v5 }
  0x1e   :  { %516 = vmatmul.mubr.f32.vlgmr.msra.gmra.mrb[0].mxu1 %v90_v7 }
  0xed   :  { %v460_v14 = vpop.f32.mrb[0].mxu0 }
  0xee   :  { %v532_v15 = vpop.f32.mrb[1].mxu0 }
  0xf1   :  { %v243_v16 = vpop.f32.mrb[0].mxu1 }
  0xf2   :  { %v533_v18 = vadd.f32 %v460_v14, %v243_v16  ;;  %v517_v19 = vpop.f32.mrb[1].mxu1 }
  0xf4   :  { %v471_v21 = vsub.f32 %v533_v18, %v489_v17 }
  0xf6   :  { %v479_v22 = vmul.f32 %v490_v20, %v471_v21 }
  0xf8   :  { %v480_v23 = vmul.f32 %v479_v22, %v479_v22 }
  0xfa   :  { %v481_v24 = vsub.f32 0.0, %v480_v23 }
  0xfc   :  { %v482_v25 = vmul.f32 1.442695, %v481_v24 }
  0xfe   :  { %544 = vpow2.f32 %v482_v25 }
 0x108   :  { %v545_v26 = vpop.eup %544 }
 0x109   :  { %484 = vst [vmem:[%s598_s4] sm:$0x3] %v545_v26 }

</bundles_post_ra>
